<compile_context>
chip_gen: v5e
topology: v5e:2x2
jax: 0.10.0
libtpu: 0.0.40
codegen_flags: <defaults>
</compile_context>

<pallas_src>
import functools

import jax
import jax.numpy as jnp
import numpy as np
from jax.experimental import pallas as pl
from jax.experimental.pallas import tpu as pltpu


def _round_up(x, m):
    return ((x + m - 1) // m) * m


def _softplus(z):
    # Numerically stable softplus (matches torch.nn.functional.softplus).
    return jnp.maximum(z, 0.0) + jnp.log(1.0 + jnp.exp(-jnp.abs(z)))


def _vmem_limit(block_bytes):
    # Size the scoped-VMEM limit from the real block footprint; cap at 32 MiB
    # so it is safe on v7x (64 MiB physical VMEM per TensorCore).
    return int(min(32 * 2 ** 20, max(8 * 2 ** 20, 2 * block_bytes)))


# ---------------------------------------------------------------------------
# Kernels
# ---------------------------------------------------------------------------
def _fused_small_kernel(w_ref, p_ref, gb_ref, o_ref, *, n_images, m_true, eps):
    """Single-call path: GEMM + batch stats + BN fold + softplus, all in VMEM.

    w_ref: (O, K) bf16, p_ref: (N, K, Lp) bf16, gb_ref: (O, 2) f32 (gamma|beta),
    o_ref: (N, O, Lp) f32.  Padded lanes of p are zero, so they add nothing to
    the stats; we divide by the true element count m_true.
    """
    s = None
    ss = None
    ys = []
    for n in range(n_images):                     # small static N only
        y = jnp.dot(w_ref[...], p_ref[n], preferred_element_type=jnp.float32)
        ys.append(y)
        ps = jnp.sum(y, axis=1, keepdims=True)    # (O, 1) cross-lane XLU reduce
        pss = jnp.sum(y * y, axis=1, keepdims=True)
        s = ps if s is None else s + ps
        ss = pss if ss is None else ss + pss
    inv_m = 1.0 / float(m_true)
    mean = s * inv_m
    # TODO(synk): E[y^2]-mean^2 can cancel for very large activations; fine at
    # these scales (train-mode biased variance, f32 accumulation).
    var = jnp.maximum(ss * inv_m - mean * mean, 0.0)
    scale = gb_ref[:, 0:1] * jax.lax.rsqrt(var + eps)     # EUP rsqrt
    shift = gb_ref[:, 1:2] - mean * scale
    for n in range(n_images):
        o_ref[n] = _softplus(ys[n] * scale + shift)


def _gemm_stats_kernel(w_ref, p_ref, y_ref, stats_ref):
    """Tiled phase 1: y tile = W @ P tile (bf16 stored), per-tile (sum, sumsq)."""
    y = jnp.dot(w_ref[...], p_ref[...], preferred_element_type=jnp.float32)
    y_ref[...] = y.astype(y_ref.dtype)            # bf16 store halves HBM traffic
    s = jnp.sum(y, axis=1, keepdims=True)         # from the f32 accumulator
    ss = jnp.sum(y * y, axis=1, keepdims=True)
    o_dim = y.shape[0]
    col = jax.lax.broadcasted_iota(jnp.int32, (o_dim, 128), 1)
    # Full (O, 128) unmasked store: lane 0 = sum, lane 1 = sumsq, rest zero.
    stats_ref[0] = jnp.where(col == 0, s, jnp.where(col == 1, ss, 0.0))


def _bn_softplus_kernel(params_ref, y_ref, o_ref):
    """Tiled phase 2: folded scale/shift + softplus."""
    z = y_ref[...].astype(jnp.float32) * params_ref[:, 0:1] + params_ref[:, 1:2]
    o_ref[...] = _softplus(z)


def _gemm_bias_softplus_kernel(w_ref, p_ref, b_ref, o_ref):
    """normalize=False path: GEMM + bias + softplus in one pass."""
    y = jnp.dot(w_ref[...], p_ref[...], preferred_element_type=jnp.float32)
    o_ref[...] = _softplus(y + b_ref[...])


# ---------------------------------------------------------------------------
# Wrapper
# ---------------------------------------------------------------------------
def conv_transpose2d_block_forward(x, weight, bias, gamma, beta, *,
                                   stride, padding, normalize=True,
                                   eps=1e-5, tm=2048, force_tiled=False):
    """x: (N, C, H, W) f32.  weight: PyTorch ConvTranspose2d layout (C, O, KH, KW).
    Returns (N, O, OH, OW) f32 with OH = (H-1)*stride - 2*padding + KH."""
    N, C, H, W = x.shape
    Cw, O, KH, KW = weight.shape
    assert Cw == C
    assert tm % 128 == 0
    OH = (H - 1) * stride - 2 * padding + KH
    OW = (W - 1) * stride - 2 * padding + KW
    pad_h = KH - 1 - padding
    pad_w = KW - 1 - padding
    # TODO(synk): padding > kernel_size-1 / output_padding would need output
    # cropping; not needed for this module's configurations.
    assert pad_h >= 0 and pad_w >= 0

    K = C * KH * KW
    L = OH * OW              # per-image output pixels
    M = N * L                # true element count per channel (for batch stats)

    # One fused XLA gather: im2col of the stride-dilated, (K-1-p)-padded input,
    # already in (N, K, OH, OW) layout -> no transpose afterwards.  Patch
    # channel ordering is c*(KH*KW) + kh*KW + kw, matching w_fwd.reshape(O, K).
    # TODO(synk): for stride>1, ~(1 - 1/stride^2) of these entries are
    # structural zeros from lhs_dilation; a subpixel-phase decomposition of the
    # transposed conv would cut patch bytes/FLOPs further.
    patches = jax.lax.conv_general_dilated_patches(
        x.astype(jnp.bfloat16), filter_shape=(KH, KW), window_strides=(1, 1),
        padding=[(pad_h, pad_h), (pad_w, pad_w)],
        lhs_dilation=(stride, stride),
        dimension_numbers=("NCHW", "OIHW", "NCHW"))          # (N, K, OH, OW)

    # ConvTranspose2d weight -> equivalent forward-conv weight:
    # flip spatially, swap in/out channels.
    w_fwd = jnp.flip(weight, axis=(2, 3)).transpose(1, 0, 2, 3)   # (O, C, KH, KW)
    wmat = w_fwd.reshape(O, K).astype(jnp.bfloat16)

    # Per-image lane padding so every store is unmasked and the final reshape
    # to NCHW needs no transpose.
    t = min(tm, _round_up(L, 128))
    Lp = _round_up(L, t)
    num_t = Lp // t
    pmat = patches.reshape(N, K, L)
    if Lp != L:
        pmat = jnp.pad(pmat, ((0, 0), (0, 0), (0, Lp - L)))

    if normalize:
        # Conv bias cancels inside BatchNorm -> dropped on this path.
        fused_bytes = (N * K * Lp * 2 + 2 * N * O * Lp * 4
                       + O * K * 2 + O * 2 * 4)
        if (not force_tiled) and N <= 8 and fused_bytes <= 6 * 2 ** 20:
            # Small-problem fast path: everything in one no-grid kernel.
            gb = jnp.stack([gamma.astype(jnp.float32),
                            beta.astype(jnp.float32)], axis=1)     # (O, 2)
            kern = functools.partial(_fused_small_kernel,
                                     n_images=N, m_true=M, eps=eps)
            out_full = pl.pallas_call(
                kern,
                out_shape=jax.ShapeDtypeStruct((N, O, Lp), jnp.float32),
                compiler_params=pltpu.CompilerParams(
                    vmem_limit_bytes=_vmem_limit(fused_bytes)),
            )(wmat, pmat, gb)
        else:
            # Phase 1: GEMM + per-tile partial stats (safe under megacore
            # "parallel" sharding because stats are per-(n, tile) outputs).
            blk1 = 2 * (K * t * 2 + O * t * 2 + O * 128 * 4) + 2 * O * K * 2
            y_bf16, pstats = pl.pallas_call(
                _gemm_stats_kernel,
                out_shape=(jax.ShapeDtypeStruct((N, O, Lp), jnp.bfloat16),
                           jax.ShapeDtypeStruct((N, num_t, O, 128),
                                                jnp.float32)),
                grid=(N, num_t),
                in_specs=[
                    pl.BlockSpec((O, K), lambda n, j: (0, 0)),
                    pl.BlockSpec((None, K, t), lambda n, j: (n, 0, j)),
                ],
                out_specs=(
                    pl.BlockSpec((None, O, t), lambda n, j: (n, 0, j)),
                    pl.BlockSpec((None, 1, O, 128), lambda n, j: (n, j, 0, 0)),
                ),
                compiler_params=pltpu.CompilerParams(
                    dimension_semantics=("parallel", "parallel"),
                    vmem_limit_bytes=_vmem_limit(blk1)),
            )(wmat, pmat)

            # Tiny (O,)-sized reductions / folds in plain JAX (glue).
            tot = jnp.sum(pstats, axis=(0, 1))                # (O, 128)
            mean = tot[:, 0] / M
            var = jnp.maximum(tot[:, 1] / M - mean * mean, 0.0)  # biased var
            scale = gamma.astype(jnp.float32) * jax.lax.rsqrt(var + eps)
            shift = beta.astype(jnp.float32) - mean * scale
            params = jnp.stack([scale, shift], axis=1)         # (O, 2)

            # Phase 2: fused scale/shift + softplus (reads bf16 y).
            blk2 = 2 * (O * t * 2 + O * t * 4) + O * 2 * 4
            out_full = pl.pallas_call(
                _bn_softplus_kernel,
                out_shape=jax.ShapeDtypeStruct((N, O, Lp), jnp.float32),
                grid=(N, num_t),
                in_specs=[
                    pl.BlockSpec((O, 2), lambda n, j: (0, 0)),
                    pl.BlockSpec((None, O, t), lambda n, j: (n, 0, j)),
                ],
                out_specs=pl.BlockSpec((None, O, t), lambda n, j: (n, 0, j)),
                compiler_params=pltpu.CompilerParams(
                    dimension_semantics=("parallel", "parallel"),
                    vmem_limit_bytes=_vmem_limit(blk2)),
            )(params, y_bf16)
        # TODO(synk): BatchNorm2d running_mean/running_var buffer updates
        # (module state) are not produced; only the train-mode forward is.
    else:
        b2 = bias.reshape(O, 1).astype(jnp.float32)
        blk = 2 * (K * t * 2 + O * t * 4) + 2 * O * K * 2 + O * 4
        out_full = pl.pallas_call(
            _gemm_bias_softplus_kernel,
            out_shape=jax.ShapeDtypeStruct((N, O, Lp), jnp.float32),
            grid=(N, num_t),
            in_specs=[
                pl.BlockSpec((O, K), lambda n, j: (0, 0)),
                pl.BlockSpec((None, K, t), lambda n, j: (n, 0, j)),
                pl.BlockSpec((O, 1), lambda n, j: (0, 0)),
            ],
            out_specs=pl.BlockSpec((None, O, t), lambda n, j: (n, 0, j)),
            compiler_params=pltpu.CompilerParams(
                dimension_semantics=("parallel", "parallel"),
                vmem_limit_bytes=_vmem_limit(blk)),
        )(wmat, pmat, b2)

    if Lp != L:
        out_full = out_full[:, :, :L]
    return out_full.reshape(N, O, OH, OW)


# ---------------------------------------------------------------------------
# Pure-JAX reference (same bf16 matmul precision as the kernel path)
# ---------------------------------------------------------------------------
def _reference(x, weight, bias, gamma, beta, *, stride, padding, normalize, eps):
    C, O, KH, KW = weight.shape
    w_fwd = jnp.flip(weight.astype(jnp.bfloat16), axis=(2, 3)).transpose(1, 0, 2, 3)
    y = jax.lax.conv_general_dilated(
        x.astype(jnp.bfloat16), w_fwd, window_strides=(1, 1),
        padding=[(KH - 1 - padding, KH - 1 - padding),
                 (KW - 1 - padding, KW - 1 - padding)],
        lhs_dilation=(stride, stride),
        dimension_numbers=("NCHW", "OIHW", "NCHW"),
        preferred_element_type=jnp.float32)
    y = y + bias[None, :, None, None]
    if normalize:
        mean = jnp.mean(y, axis=(0, 2, 3), keepdims=True)
        var = jnp.mean(jnp.square(y - mean), axis=(0, 2, 3), keepdims=True)
        y = (y - mean) * jax.lax.rsqrt(var + eps)
        y = y * gamma[None, :, None, None] + beta[None, :, None, None]
    return _softplus(y)


if __name__ == "__main__":
    # ConvTranspose2dBlock(input_dim=4, output_dim=8, kernel_size=3,
    #                      stride=2, padding=1, normalize=True): 16x16 -> 31x31
    N, C, H, W = 2, 4, 16, 16
    O, Ksz, stride, padding = 8, 3, 2, 1
    eps = 1e-5

    key = jax.random.PRNGKey(0)
    kx, kw, kb = jax.random.split(key, 3)

    x = jax.random.normal(kx, (N, C, H, W), dtype=jnp.float32)
    # PyTorch ConvTranspose2d weight layout: (in_channels, out_channels, KH, KW)
    fan_in = C * Ksz * Ksz
    bound = 1.0 / np.sqrt(fan_in)
    conv_w = jax.random.uniform(kw, (C, O, Ksz, Ksz), jnp.float32, -bound, bound)
    conv_b = jax.random.uniform(kb, (O,), jnp.float32, -bound, bound)
    bn_gamma = jnp.ones((O,), jnp.float32)   # BatchNorm2d default weight init
    bn_beta = jnp.zeros((O,), jnp.float32)   # BatchNorm2d default bias init

    ref_bn = _reference(x, conv_w, conv_b, bn_gamma, bn_beta,
                        stride=stride, padding=padding, normalize=True, eps=eps)
    ref_nb = _reference(x, conv_w, conv_b, bn_gamma, bn_beta,
                        stride=stride, padding=padding, normalize=False, eps=eps)

    # 1) normalize=True, fully-fused single-kernel fast path (default here).
    out = jax.block_until_ready(conv_transpose2d_block_forward(
        x, conv_w, conv_b, bn_gamma, bn_beta,
        stride=stride, padding=padding, normalize=True, eps=eps))
    np.testing.assert_allclose(np.asarray(out), np.asarray(ref_bn),
                               rtol=2e-3, atol=2e-3)

    # 2) normalize=True, tiled two-phase path (y kept bf16 between the two
    #    kernels, hence the slightly looser tolerance).
    out_t = jax.block_until_ready(conv_transpose2d_block_forward(
        x, conv_w, conv_b, bn_gamma, bn_beta,
        stride=stride, padding=padding, normalize=True, eps=eps,
        force_tiled=True))
    np.testing.assert_allclose(np.asarray(out_t), np.asarray(ref_bn),
                               rtol=1e-2, atol=1e-2)

    # 3) normalize=False path (single fused GEMM+bias+softplus kernel).
    out_nb = jax.block_until_ready(conv_transpose2d_block_forward(
        x, conv_w, conv_b, bn_gamma, bn_beta,
        stride=stride, padding=padding, normalize=False, eps=eps))
    np.testing.assert_allclose(np.asarray(out_nb), np.asarray(ref_nb),
                               rtol=2e-3, atol=2e-3)

    print("KERNEL_OK")
</pallas_src>

<mosaic_0001>
module attributes {stable_mosaic.version = 11 : i64} {
  func.func @_fused_small_kernel(%arg0: memref<8x36xbf16, #tpu.memory_space<vmem>>, %arg1: memref<2x36x1024xbf16, #tpu.memory_space<vmem>>, %arg2: memref<8x2xf32, #tpu.memory_space<vmem>>, %arg3: memref<2x8x1024xf32, #tpu.memory_space<vmem>>) attributes {dimension_semantics = [], scalar_prefetch = 0 : i64, scratch_operands = 0 : i64, tpu.core_type = #tpu.core_type<tc>} {
    %c0 = arith.constant 0 : index
    %c0_0 = arith.constant 0 : index
    %0 = vector.load %arg0[%c0, %c0_0] : memref<8x36xbf16, #tpu.memory_space<vmem>>, vector<8x36xbf16>
    %c0_1 = arith.constant 0 : index
    %c0_2 = arith.constant 0 : index
    %c0_3 = arith.constant 0 : index
    %1 = vector.load %arg1[%c0_1, %c0_2, %c0_3] : memref<2x36x1024xbf16, #tpu.memory_space<vmem>>, vector<1x36x1024xbf16>
    %2 = vector.shape_cast %1 : vector<1x36x1024xbf16> to vector<36x1024xbf16>
    %cst = arith.constant dense<0.000000e+00> : vector<8x1024xf32>
    %3 = tpu.matmul %0, %2, %cst {dimension_numbers = #tpu.dot_dimension_numbers<[1], [0], [0], [1], [0, 0, 1, 1], [], []>} : vector<8x36xbf16>, vector<36x1024xbf16>, vector<8x1024xf32> -> vector<8x1024xf32>
    %cst_4 = arith.constant dense<0.000000e+00> : vector<8xf32>
    %4 = vector.multi_reduction <add>, %3, %cst_4 [1] : vector<8x1024xf32> to vector<8xf32>
    %5 = vector.shape_cast %4 : vector<8xf32> to vector<8x1xf32>
    %6 = arith.mulf %3, %3 : vector<8x1024xf32>
    %cst_5 = arith.constant dense<0.000000e+00> : vector<8xf32>
    %7 = vector.multi_reduction <add>, %6, %cst_5 [1] : vector<8x1024xf32> to vector<8xf32>
    %8 = vector.shape_cast %7 : vector<8xf32> to vector<8x1xf32>
    %c0_6 = arith.constant 0 : index
    %c0_7 = arith.constant 0 : index
    %9 = vector.load %arg0[%c0_6, %c0_7] : memref<8x36xbf16, #tpu.memory_space<vmem>>, vector<8x36xbf16>
    %c1 = arith.constant 1 : index
    %c0_8 = arith.constant 0 : index
    %c0_9 = arith.constant 0 : index
    %10 = vector.load %arg1[%c1, %c0_8, %c0_9] : memref<2x36x1024xbf16, #tpu.memory_space<vmem>>, vector<1x36x1024xbf16>
    %11 = vector.shape_cast %10 : vector<1x36x1024xbf16> to vector<36x1024xbf16>
    %cst_10 = arith.constant dense<0.000000e+00> : vector<8x1024xf32>
    %12 = tpu.matmul %9, %11, %cst_10 {dimension_numbers = #tpu.dot_dimension_numbers<[1], [0], [0], [1], [0, 0, 1, 1], [], []>} : vector<8x36xbf16>, vector<36x1024xbf16>, vector<8x1024xf32> -> vector<8x1024xf32>
    %cst_11 = arith.constant dense<0.000000e+00> : vector<8xf32>
    %13 = vector.multi_reduction <add>, %12, %cst_11 [1] : vector<8x1024xf32> to vector<8xf32>
    %14 = vector.shape_cast %13 : vector<8xf32> to vector<8x1xf32>
    %15 = arith.mulf %12, %12 : vector<8x1024xf32>
    %cst_12 = arith.constant dense<0.000000e+00> : vector<8xf32>
    %16 = vector.multi_reduction <add>, %15, %cst_12 [1] : vector<8x1024xf32> to vector<8xf32>
    %17 = vector.shape_cast %16 : vector<8xf32> to vector<8x1xf32>
    %18 = arith.addf %5, %14 : vector<8x1xf32>
    %19 = arith.addf %8, %17 : vector<8x1xf32>
    %cst_13 = arith.constant 5.20291389E-4 : f32
    %20 = vector.broadcast %cst_13 : f32 to vector<8x1xf32>
    %21 = arith.mulf %18, %20 : vector<8x1xf32>
    %cst_14 = arith.constant 5.20291389E-4 : f32
    %22 = vector.broadcast %cst_14 : f32 to vector<8x1xf32>
    %23 = arith.mulf %19, %22 : vector<8x1xf32>
    %24 = arith.mulf %21, %21 : vector<8x1xf32>
    %25 = arith.subf %23, %24 : vector<8x1xf32>
    %cst_15 = arith.constant 0.000000e+00 : f32
    %26 = vector.broadcast %cst_15 : f32 to vector<8x1xf32>
    %27 = arith.maximumf %25, %26 : vector<8x1xf32>
    %c0_16 = arith.constant 0 : index
    %c0_17 = arith.constant 0 : index
    %28 = vector.load %arg2[%c0_16, %c0_17] : memref<8x2xf32, #tpu.memory_space<vmem>>, vector<8x1xf32>
    %cst_18 = arith.constant 9.99999974E-6 : f32
    %29 = vector.broadcast %cst_18 : f32 to vector<8x1xf32>
    %30 = arith.addf %27, %29 : vector<8x1xf32>
    %31 = math.rsqrt %30 : vector<8x1xf32>
    %32 = arith.mulf %28, %31 : vector<8x1xf32>
    %c0_19 = arith.constant 0 : index
    %c1_20 = arith.constant 1 : index
    %33 = vector.load %arg2[%c0_19, %c1_20] : memref<8x2xf32, #tpu.memory_space<vmem>>, vector<8x1xf32>
    %34 = arith.mulf %21, %32 : vector<8x1xf32>
    %35 = arith.subf %33, %34 : vector<8x1xf32>
    %36 = vector.broadcast %32 : vector<8x1xf32> to vector<8x1024xf32>
    %37 = arith.mulf %3, %36 : vector<8x1024xf32>
    %38 = vector.broadcast %35 : vector<8x1xf32> to vector<8x1024xf32>
    %39 = arith.addf %37, %38 : vector<8x1024xf32>
    %cst_21 = arith.constant 0.000000e+00 : f32
    %40 = vector.broadcast %cst_21 : f32 to vector<8x1024xf32>
    %41 = arith.maximumf %39, %40 : vector<8x1024xf32>
    %42 = math.absf %39 : vector<8x1024xf32>
    %cst_22 = arith.constant 0.000000e+00 : f32
    %43 = vector.broadcast %cst_22 : f32 to vector<8x1024xf32>
    %44 = arith.subf %43, %42 : vector<8x1024xf32>
    %45 = math.exp %44 : vector<8x1024xf32>
    %cst_23 = arith.constant 1.000000e+00 : f32
    %46 = vector.broadcast %cst_23 : f32 to vector<8x1024xf32>
    %47 = arith.addf %46, %45 : vector<8x1024xf32>
    %48 = math.log %47 : vector<8x1024xf32>
    %49 = arith.addf %41, %48 : vector<8x1024xf32>
    %c0_24 = arith.constant 0 : index
    %c0_25 = arith.constant 0 : index
    %c0_26 = arith.constant 0 : index
    %50 = vector.load %arg3[%c0_24, %c0_25, %c0_26] : memref<2x8x1024xf32, #tpu.memory_space<vmem>>, vector<1x8x1024xf32>
    %51 = vector.shape_cast %50 : vector<1x8x1024xf32> to vector<8x1024xf32>
    %52 = vector.shape_cast %49 : vector<8x1024xf32> to vector<1x8x1024xf32>
    tpu.vector_store %arg3[%c0_24, %c0_25, %c0_26], %52 {strides = array<i32>} : memref<2x8x1024xf32, #tpu.memory_space<vmem>>, vector<1x8x1024xf32>,
    %53 = vector.broadcast %32 : vector<8x1xf32> to vector<8x1024xf32>
    %54 = arith.mulf %12, %53 : vector<8x1024xf32>
    %55 = vector.broadcast %35 : vector<8x1xf32> to vector<8x1024xf32>
    %56 = arith.addf %54, %55 : vector<8x1024xf32>
    %cst_27 = arith.constant 0.000000e+00 : f32
    %57 = vector.broadcast %cst_27 : f32 to vector<8x1024xf32>
    %58 = arith.maximumf %56, %57 : vector<8x1024xf32>
    %59 = math.absf %56 : vector<8x1024xf32>
    %cst_28 = arith.constant 0.000000e+00 : f32
    %60 = vector.broadcast %cst_28 : f32 to vector<8x1024xf32>
    %61 = arith.subf %60, %59 : vector<8x1024xf32>
    %62 = math.exp %61 : vector<8x1024xf32>
    %cst_29 = arith.constant 1.000000e+00 : f32
    %63 = vector.broadcast %cst_29 : f32 to vector<8x1024xf32>
    %64 = arith.addf %63, %62 : vector<8x1024xf32>
    %65 = math.log %64 : vector<8x1024xf32>
    %66 = arith.addf %58, %65 : vector<8x1024xf32>
    %c1_30 = arith.constant 1 : index
    %c0_31 = arith.constant 0 : index
    %c0_32 = arith.constant 0 : index
    %67 = vector.load %arg3[%c1_30, %c0_31, %c0_32] : memref<2x8x1024xf32, #tpu.memory_space<vmem>>, vector<1x8x1024xf32>
    %68 = vector.shape_cast %67 : vector<1x8x1024xf32> to vector<8x1024xf32>
    %69 = vector.shape_cast %66 : vector<8x1024xf32> to vector<1x8x1024xf32>
    tpu.vector_store %arg3[%c1_30, %c0_31, %c0_32], %69 {strides = array<i32>} : memref<2x8x1024xf32, #tpu.memory_space<vmem>>, vector<1x8x1024xf32>,
    return
  }
}

</mosaic_0001>

<bundles_post_ra>
// kernel: tpu_custom_call.1
= control target key start
LH: loop header
LB: loop body
LE: loop exit
PB: predicated region body
PF: predicated region fallthrough
CT: control target
= control target key end

     0   :  { %vm141_vm0 = vcmask 1041408   ;;  %vm137_vm1 = vcmask 293888   ;;  %s1597_s0 = inlined_call_operand.vmem [shape: bf16[8,36], index: 0, kind: input, shape index: {}]   ;;  %s1598_s1 = inlined_call_operand.vmem [shape: bf16[2,36,1024], index: 1, kind: input, shape index: {}]   ;;  %s1599_s2 = inlined_call_operand.vmem [shape: f32[8,2], index: 2, kind: input, shape index: {}]   ;;  %s1600_s3 = inlined_call_operand.hbm [shape: f32[2,8,1024], index: 3, kind: output, shape index: {}]  }
   0x1   :  { %v33_v0 = vld [vmem:[%s1598_s1 + $0x80] sm:$0x33]  ;;  %v34_v1 = vld [vmem:[%s1598_s1 + $0x88] sm:$0x33]  ;;  %v36_v31 = vld [vmem:[%s1598_s1 + $0x98] sm:$0x33] }
   0x2   :  { %v89_v2 = vunpack.c.l.b16 %v33_v0  ;;  %v90_v3 = vunpack.c.h.b16 %v33_v0  ;;  %v91_v4 = vunpack.c.l.b16 %v34_v1  ;;  %v92_v5 = vunpack.c.h.b16 %v34_v1  ;;  %v852_v6 = vld [vmem:[%s1598_s1 + $0x40] sm:$0xf]  ;;  %v990_v12 = vld [vmem:[%s1598_s1 + $0x44] sm:$0xf]  ;;  %v860_v14 = vld [vmem:[%s1598_s1 + $0x48] sm:$0xf] }
   0x3   :  { %v994_v7 = vld [vmem:[%s1598_s1 + $0x5c] sm:$0xf0]  ;;  %v854_v13 = vld [vmem:[%s1598_s1 + $0x60] sm:$0xf0]  ;;  %v995_v15 = vld [vmem:[%s1598_s1 + $0x64] sm:$0xf0]  ;;  %v95_v36 = vunpack.c.l.b16 %v36_v31  ;;  %v96_v38 = vunpack.c.h.b16 %v36_v31 }
   0x4   :  { %v113_v8 = vpack.c.b16 %v89_v2, %v89_v2  ;;  %v114_v9 = vpack.c.b16 %v90_v3, %v90_v3  ;;  %v115_v10 = vpack.c.b16 %v91_v4, %v91_v4  ;;  %v116_v11 = vpack.c.b16 %v92_v5, %v92_v5  ;;  %v991_v16 = vld [vmem:[%s1598_s1 + $0x4c] sm:$0xf]  ;;  %v820_v22 = vld [vmem:[%s1598_s1] sm:$0xf]  ;;  %v982_v26 = vld [vmem:[%s1598_s1 + $0x4] sm:$0xf] }
   0x5   :  { %v862_v17 = vld [vmem:[%s1598_s1 + $0x68] sm:$0xf0]  ;;  %v853_v23 = vor.u32 %v994_v7, %v852_v6  ;;  %v857_v24 = vor.u32 %v990_v12, %v854_v13  ;;  %v986_v25 = vld [vmem:[%s1598_s1 + $0x1c] sm:$0xf0]  ;;  %v822_v27 = vld [vmem:[%s1598_s1 + $0x20] sm:$0xf0]  ;;  %v861_v28 = vor.u32 %v995_v15, %v860_v14  ;;  %v119_v42 = vpack.c.b16 %v95_v36, %v95_v36 }
   0x6   :  { %v143_v18 = vsel %vm141_vm0, %v113_v8, 0  ;;  %v146_v19 = vsel %vm141_vm0, %v114_v9, 0  ;;  %v149_v20 = vsel %vm141_vm0, %v115_v10, 0  ;;  %v152_v21 = vsel %vm141_vm0, %v116_v11, 0  ;;  %v828_v30 = vld [vmem:[%s1598_s1 + $0x8] sm:$0xf] }
   0x7   :  { %171 = vmatpush.bf16.msra.mxu0 %v143_v18  ;;  %184 = vmatpush.bf16.msra.mxu1 %v146_v19  ;;  %v865_v29 = vor.u32 %v991_v16, %v862_v17  ;;  %v35_v32 = vld [vmem:[%s1598_s1 + $0x90] sm:$0x33]  ;;  %v987_v33 = vld [vmem:[%s1598_s1 + $0x24] sm:$0xf0]  ;;  %v983_v34 = vld [vmem:[%s1598_s1 + $0xc] sm:$0xf]  ;;  %v821_v40 = vor.u32 %v986_v25, %v820_v22  ;;  %v825_v41 = vor.u32 %v982_v26, %v822_v27 }
   0x8   :  { %197 = vmatpush.bf16.msra.mxu2 %v149_v20  ;;  %210 = vmatpush.bf16.msra.mxu3 %v152_v21  ;;  %v830_v35 = vld [vmem:[%s1598_s1 + $0x28] sm:$0xf0]  ;;  %v93_v37 = vunpack.c.l.b16 %v35_v32  ;;  %v94_v39 = vunpack.c.h.b16 %v35_v32  ;;  %v829_v44 = vor.u32 %v987_v33, %v828_v30  ;;  %v120_v46 = vpack.c.b16 %v96_v38, %v96_v38  ;;  %v876_v48 = vld [vmem:[%s1598_s1 + $0x58] sm:$0xf]  ;;  %v868_v52 = vld [vmem:[%s1598_s1 + $0x50] sm:$0xf] }
   0x9   :  { %v833_v45 = vor.u32 %v983_v34, %v830_v35  ;;  %v997_v49 = vld [vmem:[%s1598_s1 + $0x74] sm:$0xf0]  ;;  %v161_v50 = vsel %vm141_vm0, %v119_v42, 0  ;;  %v996_v53 = vld [vmem:[%s1598_s1 + $0x6c] sm:$0xf0] }
   0xa   :  { %v117_v43 = vpack.c.b16 %v93_v37, %v93_v37  ;;  %v118_v47 = vpack.c.b16 %v94_v39, %v94_v39  ;;  %v1221_v54 = vld [vmem:[%s1597_s0] sm:$0xf]  ;;  %v907_v55 = vld [vmem:[%s1598_s1 + $0x128] sm:$0x33]  ;;  %v993_v57 = vld [vmem:[%s1598_s1 + $0x5c] sm:$0xf]  ;;  %v877_v0 = vor.u32 %v997_v49, %v876_v48  ;;  %v869_v1 = vor.u32 %v996_v53, %v868_v52 }
   0xb   :  { %172 = vmatpush.bf16.msra.mxu0 %v853_v23  ;;  %185 = vmatpush.bf16.msra.mxu1 %v857_v24  ;;  %v906_v56 = vld [vmem:[%s1598_s1 + $0x120] sm:$0x33]  ;;  %v878_v58 = vld [vmem:[%s1598_s1 + $0x78] sm:$0xf0]  ;;  %v992_v59 = vld [vmem:[%s1598_s1 + $0x54] sm:$0xf]  ;;  %v371_v60 = vunpack.c.l.b16 %v907_v55  ;;  %v372_v7 = vunpack.c.h.b16 %v907_v55 }
   0xc   :  { %198 = vmatpush.bf16.msra.mxu2 %v861_v28  ;;  %211 = vmatpush.bf16.msra.mxu3 %v865_v29  ;;  %v155_v51 = vsel %vm141_vm0, %v117_v43, 0  ;;  %v369_v61 = vunpack.c.l.b16 %v906_v56  ;;  %v164_v62 = vsel %vm141_vm0, %v120_v46, 0  ;;  %v158_v63 = vsel %vm141_vm0, %v118_v47, 0  ;;  %v870_v2 = vld [vmem:[%s1598_s1 + $0x70] sm:$0xf0] }
   0xd   :  { %v844_v3 = vld [vmem:[%s1598_s1 + $0x18] sm:$0xf]  ;;  %v836_v5 = vld [vmem:[%s1598_s1 + $0x10] sm:$0xf]  ;;  %v370_v8 = vunpack.c.h.b16 %v906_v56  ;;  %v395_v9 = vpack.c.b16 %v371_v60, %v371_v60  ;;  %v881_v11 = vor.u32 %v993_v57, %v878_v58  ;;  %v873_v12 = vor.u32 %v992_v59, %v870_v2  ;;  %v984_v13 = vld [vmem:[%s1598_s1 + $0x14] sm:$0xf] }
   0xe   :  { %v989_v4 = vld [vmem:[%s1598_s1 + $0x34] sm:$0xf0]  ;;  %v988_v6 = vld [vmem:[%s1598_s1 + $0x2c] sm:$0xf0]  ;;  %v393_v10 = vpack.c.b16 %v369_v61, %v369_v61  ;;  %v838_v16 = vld [vmem:[%s1598_s1 + $0x30] sm:$0xf0]  ;;  %v396_v19 = vpack.c.b16 %v372_v7, %v372_v7 }
   0xf   :  { %173 = vmatpush.bf16.msra.mxu0 %v821_v40  ;;  %186 = vmatpush.bf16.msra.mxu1 %v825_v41  ;;  %v845_v14 = vor.u32 %v989_v4, %v844_v3  ;;  %v837_v15 = vor.u32 %v988_v6, %v836_v5  ;;  %v985_v17 = vld [vmem:[%s1598_s1 + $0x1c] sm:$0xf]  ;;  %v394_v20 = vpack.c.b16 %v370_v8, %v370_v8  ;;  %v952_v21 = vld [vmem:[%s1598_s1 + $0xe8] sm:$0xf]  ;;  %v424_v23 = vsel %vm141_vm0, %v395_v9, 0 }
  0x10   :  { %199 = vmatpush.bf16.msra.mxu2 %v829_v44  ;;  %212 = vmatpush.bf16.msra.mxu3 %v833_v45  ;;  %v846_v18 = vld [vmem:[%s1598_s1 + $0x38] sm:$0xf0]  ;;  %v1011_v22 = vld [vmem:[%s1598_s1 + $0x104] sm:$0xf0]  ;;  %v418_v24 = vsel %vm141_vm0, %v393_v10, 0  ;;  %v841_v27 = vor.u32 %v984_v13, %v838_v16  ;;  %v427_v33 = vsel %vm141_vm0, %v396_v19, 0 }
  0x11   :  { %v944_v25 = vld [vmem:[%s1598_s1 + $0xe0] sm:$0xf]  ;;  %v849_v28 = vor.u32 %v985_v17, %v846_v18  ;;  %v909_v29 = vld [vmem:[%s1598_s1 + $0x138] sm:$0x33]  ;;  %v908_v30 = vld [vmem:[%s1598_s1 + $0x130] sm:$0x33]  ;;  %v953_v35 = vor.u32 %v1011_v22, %v952_v21 }
  0x12   :  { %882 = vmatmul.msk.bf16.vlgmr.msra.gmra.mxu0 %vm137_vm1, %v1221_v54  ;;  %883 = vmatmul.msk.bf16.vlgmr.msra.gmra.mxu1 %vm137_vm1, %v1221_v54  ;;  %v1010_v26 = vld [vmem:[%s1598_s1 + $0xfc] sm:$0xf0]  ;;  %v1007_v31 = vld [vmem:[%s1598_s1 + $0xec] sm:$0xf]  ;;  %v421_v34 = vsel %vm141_vm0, %v394_v20, 0  ;;  %v375_v39 = vunpack.c.l.b16 %v909_v29  ;;  %v373_v40 = vunpack.c.l.b16 %v908_v30  ;;  %v376_v44 = vunpack.c.h.b16 %v909_v29 }
  0x13   :  { %223 = vmatpush.bf16.msrb.mxu0 %v155_v51  ;;  %884 = vmatmul.msk.bf16.vlgmr.msra.gmra.mxu2 %vm137_vm1, %v1221_v54  ;;  %v954_v32 = vld [vmem:[%s1598_s1 + $0x108] sm:$0xf0]  ;;  %v945_v36 = vor.u32 %v1010_v26, %v944_v25  ;;  %v1006_v37 = vld [vmem:[%s1598_s1 + $0xe4] sm:$0xf]  ;;  %v920_v41 = vld [vmem:[%s1598_s1 + $0xa8] sm:$0xf]  ;;  %v374_v45 = vunpack.c.h.b16 %v908_v30 }
  0x14   :  { %249 = vmatpush.bf16.msrb.mxu2 %v161_v50  ;;  %885 = vmatmul.msk.bf16.vlgmr.msra.gmra.mxu3 %vm137_vm1, %v1221_v54  ;;  %v946_v38 = vld [vmem:[%s1598_s1 + $0x100] sm:$0xf0]  ;;  %v1003_v42 = vld [vmem:[%s1598_s1 + $0xc4] sm:$0xf0]  ;;  %v912_v43 = vld [vmem:[%s1598_s1 + $0xa0] sm:$0xf]  ;;  %v957_v46 = vor.u32 %v1007_v31, %v954_v32 }
  0x15   :  { %262 = vmatpush.bf16.msrb.mxu3 %v164_v62  ;;  %236 = vmatpush.bf16.msrb.mxu1 %v158_v63  ;;  %v949_v47 = vor.u32 %v1006_v37, %v946_v38  ;;  %v1002_v48 = vld [vmem:[%s1598_s1 + $0xbc] sm:$0xf0]  ;;  %v998_v49 = vld [vmem:[%s1598_s1 + $0xa4] sm:$0xf] }
  0x17   :  { %224 = vmatpush.bf16.msrb.mxu0 %v869_v1 }
  0x18   :  { %250 = vmatpush.bf16.msrb.mxu2 %v877_v0 }
  0x19   :  { %263 = vmatpush.bf16.msrb.mxu3 %v881_v11  ;;  %237 = vmatpush.bf16.msrb.mxu1 %v873_v12 }
  0x1b   :  { %225 = vmatpush.bf16.msrb.mxu0 %v837_v15 }
  0x1c   :  { %251 = vmatpush.bf16.msrb.mxu2 %v845_v14 }
  0x1d   :  { %238 = vmatpush.bf16.msrb.mxu1 %v841_v27  ;;  %264 = vmatpush.bf16.msrb.mxu3 %v849_v28 }
  0x1f   :  { %446 = vmatpush.bf16.msra.mxu0 %v418_v24 }
  0x20   :  { %472 = vmatpush.bf16.msra.mxu2 %v424_v23 }
  0x21   :  { %485 = vmatpush.bf16.msra.mxu3 %v427_v33  ;;  %459 = vmatpush.bf16.msra.mxu1 %v421_v34 }
  0x22   :  { %8 = vsyncpa [#allocation3], 0  ;;  %v914_v50 = vld [vmem:[%s1598_s1 + $0xc0] sm:$0xf0]  ;;  %v999_v51 = vld [vmem:[%s1598_s1 + $0xac] sm:$0xf]  ;;  %v399_v53 = vpack.c.b16 %v375_v39, %v375_v39  ;;  %v397_v55 = vpack.c.b16 %v373_v40, %v373_v40  ;;  %v921_v56 = vor.u32 %v1003_v42, %v920_v41  ;;  %v913_v57 = vor.u32 %v1002_v48, %v912_v43  ;;  %886 = vmatmul.msk.bf16.vlgmr.msrb.gmra.mxu0 %vm137_vm1, %v1221_v54 }
  0x23   :  { %447 = vmatpush.bf16.msra.mxu0 %v945_v36  ;;  %v922_v52 = vld [vmem:[%s1598_s1 + $0xc8] sm:$0xf0]  ;;  %v400_v58 = vpack.c.b16 %v376_v44, %v376_v44  ;;  %v398_v59 = vpack.c.b16 %v374_v45, %v374_v45  ;;  %v917_v60 = vor.u32 %v998_v49, %v914_v50  ;;  %v968_v62 = vld [vmem:[%s1598_s1 + $0xf8] sm:$0xf]  ;;  %887 = vmatmul.msk.bf16.vlgmr.msrb.gmra.mxu1 %vm137_vm1, %v1221_v54  ;;  %v960_v0 = vld [vmem:[%s1598_s1 + $0xf0] sm:$0xf] }
  0x24   :  { %473 = vmatpush.bf16.msra.mxu2 %v953_v35  ;;  %v925_v61 = vor.u32 %v999_v51, %v922_v52  ;;  %v1013_v63 = vld [vmem:[%s1598_s1 + $0x114] sm:$0xf0]  ;;  %v1012_v1 = vld [vmem:[%s1598_s1 + $0x10c] sm:$0xf0]  ;;  %889 = vmatmul.msk.bf16.vlgmr.msrb.gmra.mxu3 %vm137_vm1, %v1221_v54  ;;  %v436_v2 = vsel %vm141_vm0, %v399_v53, 0  ;;  %v430_v3 = vsel %vm141_vm0, %v397_v55, 0 }
  0x25   :  { %486 = vmatpush.bf16.msra.mxu3 %v957_v46  ;;  %460 = vmatpush.bf16.msra.mxu1 %v949_v47  ;;  %v1009_v4 = vld [vmem:[%s1598_s1 + $0xfc] sm:$0xf]  ;;  %v439_v6 = vsel %vm141_vm0, %v400_v58, 0  ;;  %v433_v7 = vsel %vm141_vm0, %v398_v59, 0  ;;  %v1008_v8 = vld [vmem:[%s1598_s1 + $0xf4] sm:$0xf]  ;;  %v969_v10 = vor.u32 %v1013_v63, %v968_v62  ;;  %v961_v11 = vor.u32 %v1012_v1, %v960_v0 }
  0x26   :  { %888 = vmatmul.msk.bf16.vlgmr.msrb.gmra.mxu2 %vm137_vm1, %v1221_v54  ;;  %v970_v5 = vld [vmem:[%s1598_s1 + $0x118] sm:$0xf0]  ;;  %v962_v9 = vld [vmem:[%s1598_s1 + $0x110] sm:$0xf0]  ;;  %v936_v12 = vld [vmem:[%s1598_s1 + $0xb8] sm:$0xf] }
  0x27   :  { %448 = vmatpush.bf16.msra.mxu0 %v913_v57  ;;  %v1005_v13 = vld [vmem:[%s1598_s1 + $0xd4] sm:$0xf0]  ;;  %v973_v14 = vor.u32 %v1009_v4, %v970_v5  ;;  %v965_v15 = vor.u32 %v1008_v8, %v962_v9  ;;  %v928_v16 = vld [vmem:[%s1598_s1 + $0xb0] sm:$0xf]  ;;  %v1000_v18 = vld [vmem:[%s1598_s1 + $0xb4] sm:$0xf] }
  0x28   :  { %474 = vmatpush.bf16.msra.mxu2 %v921_v56  ;;  %v1004_v17 = vld [vmem:[%s1598_s1 + $0xcc] sm:$0xf0]  ;;  %v930_v19 = vld [vmem:[%s1598_s1 + $0xd0] sm:$0xf0]  ;;  %v1001_v20 = vld [vmem:[%s1598_s1 + $0xbc] sm:$0xf]  ;;  %v937_v22 = vor.u32 %v1005_v13, %v936_v12 }
  0x29   :  { %461 = vmatpush.bf16.msra.mxu1 %v917_v60  ;;  %487 = vmatpush.bf16.msra.mxu3 %v925_v61  ;;  %v938_v21 = vld [vmem:[%s1598_s1 + $0xd8] sm:$0xf0]  ;;  %v929_v23 = vor.u32 %v1004_v17, %v928_v16  ;;  %v933_v24 = vor.u32 %v1000_v18, %v930_v19  ;;  %s1115_s20 = smov 1   ;;  %s806_s24 = sshll.u32 %s1600_s3, 4  ;;  %s807_s24 = int_to_ptr.hbm [resolvable:$true] %s806_s24 }
  0x2a   :  { %v941_v25 = vor.u32 %v1001_v20, %v938_v21  ;;  %s1118_s3 = smov 1024   ;;  %s1119_s25 = smov 64  }
  0x2b   :  { %498 = vmatpush.bf16.msrb.mxu0 %v430_v3 }
  0x2c   :  { %524 = vmatpush.bf16.msrb.mxu2 %v436_v2 }
  0x2d   :  { %537 = vmatpush.bf16.msrb.mxu3 %v439_v6  ;;  %511 = vmatpush.bf16.msrb.mxu1 %v433_v7 }
  0x2f   :  { %499 = vmatpush.bf16.msrb.mxu0 %v961_v11 }
  0x30   :  { %525 = vmatpush.bf16.msrb.mxu2 %v969_v10 }
  0x31   :  { %538 = vmatpush.bf16.msrb.mxu3 %v973_v14  ;;  %512 = vmatpush.bf16.msrb.mxu1 %v965_v15 }
  0x32   :  { %974 = vmatmul.msk.bf16.vlgmr.msra.gmra.mxu0 %vm137_vm1, %v1221_v54 }
  0x33   :  { %500 = vmatpush.bf16.msrb.mxu0 %v929_v23  ;;  %975 = vmatmul.msk.bf16.vlgmr.msra.gmra.mxu1 %vm137_vm1, %v1221_v54 }
  0x34   :  { %526 = vmatpush.bf16.msrb.mxu2 %v937_v22  ;;  %977 = vmatmul.msk.bf16.vlgmr.msra.gmra.mxu3 %vm137_vm1, %v1221_v54 }
  0x35   :  { %513 = vmatpush.bf16.msrb.mxu1 %v933_v24  ;;  %539 = vmatpush.bf16.msrb.mxu3 %v941_v25 }
  0x36   :  { %976 = vmatmul.msk.bf16.vlgmr.msra.gmra.mxu2 %vm137_vm1, %v1221_v54 }
  0x42   :  { %978 = vmatmul.msk.bf16.vlgmr.msrb.gmra.mxu0 %vm137_vm1, %v1221_v54 }
  0x43   :  { %979 = vmatmul.msk.bf16.vlgmr.msrb.gmra.mxu1 %vm137_vm1, %v1221_v54 }
  0x44   :  { %981 = vmatmul.msk.bf16.vlgmr.msrb.gmra.mxu3 %vm137_vm1, %v1221_v54 }
  0x46   :  { %980 = vmatmul.msk.bf16.vlgmr.msrb.gmra.mxu2 %vm137_vm1, %v1221_v54 }
  0x8f   :  { %v1409_v26 = vpop.f32.mrf.mxu0  ;;  %v1411_v27 = vpop.f32.mrf.mxu1 }
  0x90   :  { %v279_v30 = vmul.f32 %v1409_v26, %v1409_v26  ;;  %v280_v31 = vmul.f32 %v1411_v27, %v1411_v27  ;;  %v270_v34 = vadd.f32 %v1411_v27, %v1409_v26 }
  0x92   :  { %v287_v35 = vadd.f32 %v280_v31, %v279_v30 }
  0x96   :  { %v1413_v28 = vpop.f32.mrf.mxu2 }
  0x97   :  { %v1415_v29 = vpop.f32.mrf.mxu3  ;;  %v177_v32 = vpop.f32.mrf.mxu0  ;;  %v281_v54 = vmul.f32 %v1413_v28, %v1413_v28  ;;  %v271_v36 = vadd.f32 %v270_v34, %v1413_v28 }
  0x98   :  { %v190_v33 = vpop.f32.mrf.mxu1  ;;  %v282_v38 = vmul.f32 %v1415_v29, %v1415_v29 }
  0x99   :  { %v288_v37 = vadd.f32 %v287_v35, %v281_v54  ;;  %v272_v41 = vadd.f32 %v271_v36, %v1415_v29 }
  0x9b   :  { %v289_v45 = vadd.f32 %v288_v37, %v282_v38 }
  0x9e   :  { %v203_v39 = vpop.f32.mrf.mxu2 }
  0x9f   :  { %v216_v40 = vpop.f32.mrf.mxu3  ;;  %v1429_v42 = vpop.f32.mrf.mxu0 }
  0xa0   :  { %v1431_v43 = vpop.f32.mrf.mxu1  ;;  %v283_v44 = vmul.f32 %v1429_v42, %v1429_v42  ;;  %v273_v46 = vadd.f32 %v272_v41, %v1429_v42 }
  0xa1   :  { %v284_v48 = vmul.f32 %v1431_v43, %v1431_v43 }
  0xa2   :  { %v290_v47 = vadd.f32 %v289_v45, %v283_v44  ;;  %v274_v49 = vadd.f32 %v273_v46, %v1431_v43 }
  0xa4   :  { %v291_v58 = vadd.f32 %v290_v47, %v284_v48 }
  0xa7   :  { %v1441_v51 = vpop.f32.mrf.mxu3  ;;  %v229_v53 = vpop.f32.mrf.mxu0 }
  0xa8   :  { %v242_v55 = vpop.f32.mrf.mxu1  ;;  %v286_v57 = vmul.f32 %v1441_v51, %v1441_v51 }
  0xa9   :  { %v1439_v50 = vpop.f32.mrf.mxu2 }
  0xaa   :  { %v285_v52 = vmul.f32 %v1439_v50, %v1439_v50  ;;  %v275_v56 = vadd.f32 %v274_v49, %v1439_v50 }
  0xac   :  { %v276_v59 = vadd.f32 %v275_v56, %v1441_v51  ;;  %v292_v60 = vadd.f32 %v291_v58, %v285_v52  ;;  %v1114_v52 = vmov 0  }
  0xad   :  { %1020 = vset.pattern.permute.xlu2 %v1114_v52 }
  0xae   :  { %277 = vadd.xlane.f32.xlu0 %v276_v59  ;;  %v293_v61 = vadd.f32 %v292_v60, %v286_v57 }
  0xaf   :  { %v268_v63 = vpop.f32.mrf.mxu3  ;;  %v1449_v0 = vpop.f32.mrf.mxu0 }
  0xb0   :  { %294 = vadd.xlane.f32.xlu1 %v293_v61  ;;  %v1451_v1 = vpop.f32.mrf.mxu1  ;;  %v554_v4 = vmul.f32 %v1449_v0, %v1449_v0 }
  0xb1   :  { %v255_v62 = vpop.f32.mrf.mxu2  ;;  %v555_v5 = vmul.f32 %v1451_v1, %v1451_v1  ;;  %v545_v8 = vadd.f32 %v1451_v1, %v1449_v0 }
  0xb3   :  { %v562_v10 = vadd.f32 %v555_v5, %v554_v4  ;;  %v578_v4 = vld [vmem:[%s1599_s2] sm:$0xff]  ;;  %s1117_s2 = smov [#allocation2]  }
  0xb4   :  { %s804_s21 = sshll.u32 %s1117_s2, 4  ;;  %s805_s21 = int_to_ptr.vmem [resolvable:$true] %s804_s21 }
  0xb7   :  { %v1455_v3 = vpop.f32.mrf.mxu3  ;;  %v452_v6 = vpop.f32.mrf.mxu0 }
  0xb8   :  { %v465_v7 = vpop.f32.mrf.mxu1  ;;  %v557_v13 = vmul.f32 %v1455_v3, %v1455_v3 }
  0xb9   :  { %v1453_v2 = vpop.f32.mrf.mxu2 }
  0xba   :  { %v556_v9 = vmul.f32 %v1453_v2, %v1453_v2  ;;  %v546_v11 = vadd.f32 %v545_v8, %v1453_v2 }
  0xbc   :  { %v563_v12 = vadd.f32 %v562_v10, %v556_v9  ;;  %v547_v16 = vadd.f32 %v546_v11, %v1455_v3  ;;  %v1116_v9 = vmov 1  }
  0xbd   :  { %1021 = vset.pattern.permute.xlu0 %v1116_v9 }
  0xbe   :  { %v564_v20 = vadd.f32 %v563_v12, %v557_v13 }
  0xbf   :  { %v491_v15 = vpop.f32.mrf.mxu3  ;;  %v1469_v17 = vpop.f32.mrf.mxu0 }
  0xc0   :  { %v1471_v18 = vpop.f32.mrf.mxu1  ;;  %v558_v19 = vmul.f32 %v1469_v17, %v1469_v17  ;;  %v548_v21 = vadd.f32 %v547_v16, %v1469_v17 }
  0xc1   :  { %v478_v14 = vpop.f32.mrf.mxu2  ;;  %v559_v23 = vmul.f32 %v1471_v18, %v1471_v18 }
  0xc2   :  { %v565_v22 = vadd.f32 %v564_v20, %v558_v19  ;;  %v549_v24 = vadd.f32 %v548_v21, %v1471_v18 }
  0xc4   :  { %v566_v35 = vadd.f32 %v565_v22, %v559_v23 }
  0xc7   :  { %v1481_v30 = vpop.f32.mrf.mxu3  ;;  %v504_v32 = vpop.f32.mrf.mxu0 }
  0xc8   :  { %v517_v33 = vpop.f32.mrf.mxu1  ;;  %v561_v54 = vmul.f32 %v1481_v30, %v1481_v30 }
  0xc9   :  { %v1479_v25 = vpop.f32.mrf.mxu2 }
  0xca   :  { %v560_v31 = vmul.f32 %v1479_v25, %v1479_v25  ;;  %v550_v34 = vadd.f32 %v549_v24, %v1479_v25 }
  0xcc   :  { %v551_v36 = vadd.f32 %v550_v34, %v1481_v30  ;;  %v567_v37 = vadd.f32 %v566_v35, %v560_v31 }
  0xce   :  { %552 = vadd.xlane.f32.xlu0 %v551_v36  ;;  %v568_v38 = vadd.f32 %v567_v37, %v561_v54 }
  0xcf   :  { %v543_v40 = vpop.f32.mrf.mxu3 }
  0xd0   :  { %569 = vadd.xlane.f32.xlu1 %v568_v38 }
  0xd1   :  { %v530_v39 = vpop.f32.mrf.mxu2 }
 0x121   :  { %v278_v41 = vpop.xlane.xlu0 %277 }
 0x123   :  { %v295_v44 = vpop.xlane.xlu1 %294 }
 0x141   :  { %v553_v45 = vpop.xlane.xlu0 %552 }
 0x142   :  { %v571_v46 = vadd.f32 %v553_v45, %v278_v41 }
 0x143   :  { %v570_v47 = vpop.xlane.xlu1 %569 }
 0x144   :  { %v573_v48 = vmul.f32 0.0005202914, %v571_v46  ;;  %v572_v49 = vadd.f32 %v570_v47, %v295_v44 }
 0x146   :  { %v575_v53 = vmul.f32 %v573_v48, %v573_v48  ;;  %v574_v55 = vmul.f32 0.0005202914, %v572_v49 }
 0x148   :  { %v576_v56 = vsub.f32 %v574_v55, %v575_v53 }
 0x14a   :  { %v577_v57 = vmax.f32 %v576_v56, 0.0 }
 0x14c   :  { %v579_v58 = vadd.f32 1e-05, %v577_v57 }
 0x14e   :  { %1022 = vrsqrt.f32 %v579_v58  ;;  %vm586_vm3 = vweird.f32 %v579_v58 }
 0x154   :  { %v1023_v59 = vpop.eup %1022 }
 0x155   :  { %v581_v60 = vmul.f32 %v1023_v59, %v579_v58  ;;  %vm587_vm2 = vweird.f32 %v1023_v59 }
 0x156   :  { %vm588_vm4 = vmor %vm586_vm3, %vm587_vm2 }
 0x157   :  { %v582_v61 = vmul.f32 %v1023_v59, %v581_v60 }
 0x159   :  { %v583_v62 = vmul.f32 0.5, %v582_v61 }
 0x15b   :  { %v584_v63 = vsub.f32 1.5, %v583_v62 }
 0x15d   :  { %v585_v5 = vmul.f32 %v1023_v59, %v584_v63 }
 0x15f   :  { %v589_v6 = vsel %vm588_vm4, %v1023_v59, %v585_v5 }
 0x160   :  { %v590_v7 = vmul.f32 %v589_v6, %v578_v4 }
 0x162   :  { %v591_v8 = vmul.f32 %v590_v7, %v573_v48 }
 0x164   :  { %593 = vrot.lane.b32.xlu2 %v591_v8, %s1115_s20 }
 0x16c   :  { %599 = vperm.xlu2 %1020, %v590_v7  }
 0x1be   :  { %v594_v10 = vpop.permute.xlu2 %593 }
 0x1bf   :  { %v596_v11 = vsub.f32 %v578_v4, %v594_v10 }
 0x1c1   :  { %612 = vperm.xlu0 %1021, %v596_v11  }
 0x1c6   :  { %v600_v12 = vpop.permute.xlu2 %599 }
 0x1c7   :  { %v602_v13 = vmul.f32 %v600_v12, %v1409_v26  ;;  %v603_v14 = vmul.f32 %v600_v12, %v1411_v27  ;;  %v604_v15 = vmul.f32 %v600_v12, %v1413_v28  ;;  %v605_v16 = vmul.f32 %v600_v12, %v1415_v29 }
 0x1c8   :  { %v606_v19 = vmul.f32 %v600_v12, %v1429_v42  ;;  %v607_v20 = vmul.f32 %v600_v12, %v1431_v43  ;;  %v608_v21 = vmul.f32 %v600_v12, %v1439_v50  ;;  %v609_v23 = vmul.f32 %v600_v12, %v1441_v51 }
 0x1c9   :  { %v703_v48 = vmul.f32 %v600_v12, %v1449_v0  ;;  %v704_v55 = vmul.f32 %v600_v12, %v1451_v1  ;;  %v705_v56 = vmul.f32 %v600_v12, %v1453_v2  ;;  %v706_v58 = vmul.f32 %v600_v12, %v1455_v3 }
 0x1ca   :  { %v707_v61 = vmul.f32 %v600_v12, %v1469_v17  ;;  %v708_v1 = vmul.f32 %v600_v12, %v1471_v18  ;;  %v709_v3 = vmul.f32 %v600_v12, %v1479_v25  ;;  %v710_v4 = vmul.f32 %v600_v12, %v1481_v30 }
 0x233   :  { %v1499_v22 = vpop.permute.xlu0 %612 }
 0x234   :  { %v1503_v24 = vadd.f32 %v1499_v22, %v602_v13  ;;  %v1506_v26 = vadd.f32 %v1499_v22, %v603_v14  ;;  %v1509_v27 = vadd.f32 %v1499_v22, %v604_v15  ;;  %v1512_v28 = vadd.f32 %v1499_v22, %v605_v16 }
 0x235   :  { %v1515_v29 = vadd.f32 %v1499_v22, %v606_v19  ;;  %v1518_v42 = vadd.f32 %v1499_v22, %v607_v20  ;;  %v1521_v43 = vadd.f32 %v1499_v22, %v608_v21  ;;  %v1524_v50 = vadd.f32 %v1499_v22, %v609_v23 }
 0x236   :  { %v631_v51 = vand.u32 2147483647, %v1503_v24  ;;  %v632_v31 = vand.u32 2147483647, %v1506_v26  ;;  %v633_v32 = vand.u32 2147483647, %v1509_v27  ;;  %v1539_v60 = vadd.f32 %v703_v48, %v1499_v22 }
 0x237   :  { %v634_v33 = vand.u32 2147483647, %v1512_v28  ;;  %v635_v34 = vand.u32 2147483647, %v1515_v29  ;;  %v636_v54 = vand.u32 2147483647, %v1518_v42  ;;  %v1543_v62 = vadd.f32 %v704_v55, %v1499_v22 }
 0x238   :  { %v637_v35 = vand.u32 2147483647, %v1521_v43  ;;  %v638_v36 = vand.u32 2147483647, %v1524_v50  ;;  %v639_v37 = vsub.f32 0.0, %v631_v51  ;;  %v640_v38 = vsub.f32 0.0, %v632_v31 }
 0x239   :  { %v641_v39 = vsub.f32 0.0, %v633_v32  ;;  %v642_v40 = vsub.f32 0.0, %v634_v33  ;;  %v643_v41 = vsub.f32 0.0, %v635_v34  ;;  %v644_v44 = vsub.f32 0.0, %v636_v54 }
 0x23a   :  { %v645_v45 = vsub.f32 0.0, %v637_v35  ;;  %v647_v46 = vmul.f32 1.442695, %v639_v37  ;;  %v649_v47 = vmul.f32 1.442695, %v640_v38  ;;  %v646_v49 = vsub.f32 0.0, %v638_v36 }
 0x23b   :  { %v651_v52 = vmul.f32 1.442695, %v641_v39  ;;  %v653_v53 = vmul.f32 1.442695, %v642_v40  ;;  %v655_v57 = vmul.f32 1.442695, %v643_v41  ;;  %v1547_v63 = vadd.f32 %v705_v56, %v1499_v22 }
 0x23c   :  { %1024 = vpow2.f32 %v647_v46  ;;  %v657_v59 = vmul.f32 1.442695, %v644_v44  ;;  %v659_v0 = vmul.f32 1.442695, %v645_v45  ;;  %v661_v2 = vmul.f32 1.442695, %v646_v49 }
 0x23d   :  { %1026 = vpow2.f32 %v649_v47  ;;  %v1552_v5 = vadd.f32 %v706_v58, %v1499_v22  ;;  %v623_v17 = vmax.f32 %v1503_v24, 0.0  ;;  %v1556_v6 = vadd.f32 %v707_v61, %v1499_v22 }
 0x23e   :  { %1028 = vpow2.f32 %v651_v52  ;;  %v727_v18 = vand.u32 2147483647, %v1539_v60  ;;  %v624_v8 = vmax.f32 %v1506_v26, 0.0  ;;  %v1561_v25 = vadd.f32 %v708_v1, %v1499_v22 }
 0x23f   :  { %1030 = vpow2.f32 %v653_v53  ;;  %v728_v30 = vand.u32 2147483647, %v1543_v62  ;;  %v1565_v11 = vadd.f32 %v709_v3, %v1499_v22  ;;  %v729_v12 = vand.u32 2147483647, %v1547_v63 }
 0x240   :  { %1032 = vpow2.f32 %v655_v57  ;;  %v625_v14 = vmax.f32 %v1509_v27, 0.0  ;;  %v1570_v16 = vadd.f32 %v710_v4, %v1499_v22  ;;  %v730_v19 = vand.u32 2147483647, %v1552_v5 }
 0x241   :  { %1034 = vpow2.f32 %v657_v59  ;;  %v731_v23 = vand.u32 2147483647, %v1556_v6  ;;  %v735_v51 = vsub.f32 0.0, %v727_v18  ;;  %v732_v33 = vand.u32 2147483647, %v1561_v25 }
 0x242   :  { %v1025_v7 = vpop.eup %1024  ;;  %1036 = vpow2.f32 %v659_v0  ;;  %v736_v34 = vsub.f32 0.0, %v728_v30  ;;  %v733_v22 = vand.u32 2147483647, %v1565_v11  ;;  %v737_v35 = vsub.f32 0.0, %v729_v12 }
 0x243   :  { %v1027_v9 = vpop.eup %1026  ;;  %1038 = vpow2.f32 %v661_v2  ;;  %v663_v10 = vadd.f32 1.0, %v1025_v7  ;;  %v734_v38 = vand.u32 2147483647, %v1570_v16  ;;  %v738_v39 = vsub.f32 0.0, %v730_v19 }
 0x244   :  { %v1029_v13 = vpop.eup %1028  ;;  %v664_v15 = vadd.f32 1.0, %v1027_v9  ;;  %v739_v44 = vsub.f32 0.0, %v731_v23  ;;  %v743_v45 = vmul.f32 1.442695, %v735_v51  ;;  %v740_v47 = vsub.f32 0.0, %v732_v33 }
 0x245   :  { %v1031_v20 = vpop.eup %1030  ;;  %v665_v21 = vadd.f32 1.0, %v1029_v13  ;;  %1040 = vlog2.f32 %v663_v10  ;;  %v745_v48 = vmul.f32 1.442695, %v736_v34  ;;  %v626_v52 = vmax.f32 %v1512_v28, 0.0 }
 0x246   :  { %v1033_v31 = vpop.eup %1032  ;;  %v666_v32 = vadd.f32 1.0, %v1031_v20  ;;  %1042 = vlog2.f32 %v664_v15  ;;  %v741_v53 = vsub.f32 0.0, %v733_v22  ;;  %v747_v55 = vmul.f32 1.442695, %v737_v35 }
 0x247   :  { %v1035_v54 = vpop.eup %1034  ;;  %v667_v27 = vadd.f32 1.0, %v1033_v31  ;;  %1044 = vlog2.f32 %v665_v21  ;;  %v742_v58 = vsub.f32 0.0, %v734_v38  ;;  %v749_v59 = vmul.f32 1.442695, %v738_v39 }
 0x248   :  { %v1037_v36 = vpop.eup %1036  ;;  %v668_v37 = vadd.f32 1.0, %v1035_v54  ;;  %1046 = vlog2.f32 %v666_v32  ;;  %v627_v0 = vmax.f32 %v1515_v29, 0.0  ;;  %v751_v2 = vmul.f32 1.442695, %v739_v44 }
 0x249   :  { %v1039_v40 = vpop.eup %1038  ;;  %v669_v41 = vadd.f32 1.0, %v1037_v36  ;;  %1048 = vlog2.f32 %v667_v27  ;;  %v753_v28 = vmul.f32 1.442695, %v740_v47  ;;  %v755_v10 = vmul.f32 1.442695, %v741_v53 }
 0x24a   :  { %v670_v46 = vadd.f32 1.0, %v1039_v40  ;;  %1050 = vlog2.f32 %v668_v37  ;;  %v757_v15 = vmul.f32 1.442695, %v742_v58  ;;  %v628_v20 = vmax.f32 %v1518_v42, 0.0 }
 0x24b   :  { %v1041_v49 = vpop.eup %1040  ;;  %1052 = vlog2.f32 %v669_v41  ;;  %v629_v23 = vmax.f32 %v1521_v43, 0.0  ;;  %v720_v53 = vmax.f32 %v1543_v62, 0.0  ;;  %v724_v62 = vmax.f32 %v1561_v25, 0.0 }
 0x24c   :  { %v1043_v56 = vpop.eup %1042  ;;  %v672_v57 = vmul.f32 0.6931472, %v1041_v49  ;;  %1054 = vlog2.f32 %v670_v46 }
 0x24d   :  { %v1045_v61 = vpop.eup %1044  ;;  %v674_v1 = vmul.f32 0.6931472, %v1043_v56  ;;  %1056 = vpow2.f32 %v743_v45 }
 0x24e   :  { %v1047_v3 = vpop.eup %1046  ;;  %v676_v4 = vmul.f32 0.6931472, %v1045_v61  ;;  %v687_v18 = vadd.f32 %v672_v57, %v623_v17  ;;  %1058 = vpow2.f32 %v745_v48  ;;  %v719_v48 = vmax.f32 %v1539_v60, 0.0 }
 0x24f   :  { %v1049_v7 = vpop.eup %1048  ;;  %v678_v30 = vmul.f32 0.6931472, %v1047_v3  ;;  %v688_v9 = vadd.f32 %v674_v1, %v624_v8  ;;  %1060 = vpow2.f32 %v747_v55  ;;  %v721_v57 = vmax.f32 %v1547_v63, 0.0 }
 0x250   :  { %v1051_v12 = vpop.eup %1050  ;;  %v680_v13 = vmul.f32 0.6931472, %v1049_v7  ;;  %v689_v29 = vadd.f32 %v676_v4, %v625_v14  ;;  %695 = vst [vmem:[#allocation2] sm:$0xff] %v687_v18  ;;  %1062 = vpow2.f32 %v749_v59  ;;  %v630_v14 = vmax.f32 %v1524_v50, 0.0 }
 0x251   :  { %v1053_v19 = vpop.eup %1052  ;;  %v682_v24 = vmul.f32 0.6931472, %v1051_v12  ;;  %v690_v17 = vadd.f32 %v678_v30, %v626_v52  ;;  %696 = vst [vmem:[#allocation2 + $0x8] sm:$0xff] %v688_v9  ;;  %1064 = vpow2.f32 %v751_v2  ;;  %v723_v4 = vmax.f32 %v1556_v6, 0.0 }
 0x252   :  { %v1055_v21 = vpop.eup %1054  ;;  %v684_v26 = vmul.f32 0.6931472, %v1053_v19  ;;  %v691_v8 = vadd.f32 %v680_v13, %v627_v0  ;;  %697 = vst [vmem:[#allocation2 + $0x10] sm:$0xff] %v689_v29  ;;  %1066 = vpow2.f32 %v753_v28  ;;  %v722_v0 = vmax.f32 %v1552_v5, 0.0 }
 0x253   :  { %v1057_v51 = vpop.eup %1056  ;;  %v686_v31 = vmul.f32 0.6931472, %v1055_v21  ;;  %v692_v32 = vadd.f32 %v682_v24, %v628_v20  ;;  %698 = vst [vmem:[#allocation2 + $0x18] sm:$0xff] %v690_v17  ;;  %1068 = vpow2.f32 %v755_v10  ;;  %v725_v5 = vmax.f32 %v1565_v11, 0.0 }
 0x254   :  { %v1059_v33 = vpop.eup %1058  ;;  %v693_v42 = vadd.f32 %v684_v26, %v629_v23  ;;  %699 = vst [vmem:[#allocation2 + $0x20] sm:$0xff] %v691_v8  ;;  %1070 = vpow2.f32 %v757_v15  ;;  %v759_v34 = vadd.f32 1.0, %v1057_v51  ;;  %v726_v10 = vmax.f32 %v1570_v16, 0.0 }
 0x255   :  { %v1061_v54 = vpop.eup %1060  ;;  %v694_v27 = vadd.f32 %v686_v31, %v630_v14  ;;  %700 = vst [vmem:[#allocation2 + $0x28] sm:$0xff] %v692_v32  ;;  %v760_v43 = vadd.f32 1.0, %v1059_v33 }
 0x256   :  { %v1063_v22 = vpop.eup %1062  ;;  %701 = vst [vmem:[#allocation2 + $0x30] sm:$0xff] %v693_v42  ;;  %v761_v35 = vadd.f32 1.0, %v1061_v54  ;;  %1072 = vlog2.f32 %v759_v34 }
 0x257   :  { %v1065_v36 = vpop.eup %1064  ;;  %702 = vst [vmem:[#allocation2 + $0x38] sm:$0xff] %v694_v27  ;;  %v762_v50 = vadd.f32 1.0, %v1063_v22  ;;  %1074 = vlog2.f32 %v760_v43 }
 0x258   :  { %v1067_v37 = vpop.eup %1066  ;;  %v763_v38 = vadd.f32 1.0, %v1065_v36  ;;  %1076 = vlog2.f32 %v761_v35 }
 0x259   :  { %v1069_v39 = vpop.eup %1068  ;;  %v764_v40 = vadd.f32 1.0, %v1067_v37  ;;  %1078 = vlog2.f32 %v762_v50 }
 0x25a   :  { %v1071_v41 = vpop.eup %1070  ;;  %v765_v44 = vadd.f32 1.0, %v1069_v39  ;;  %1080 = vlog2.f32 %v763_v38 }
 0x25b   :  { %v766_v45 = vadd.f32 1.0, %v1071_v41  ;;  %1082 = vlog2.f32 %v764_v40 }
 0x25c   :  { %v1073_v46 = vpop.eup %1072  ;;  %1084 = vlog2.f32 %v765_v44 }
 0x25d   :  { %v1075_v47 = vpop.eup %1074  ;;  %v768_v49 = vmul.f32 0.6931472, %v1073_v46  ;;  %1086 = vlog2.f32 %v766_v45 }
 0x25e   :  { %v1077_v52 = vpop.eup %1076  ;;  %v770_v55 = vmul.f32 0.6931472, %v1075_v47 }
 0x25f   :  { %v1079_v56 = vpop.eup %1078  ;;  %v772_v58 = vmul.f32 0.6931472, %v1077_v52  ;;  %v783_v59 = vadd.f32 %v768_v49, %v719_v48 }
 0x260   :  { %v1081_v61 = vpop.eup %1080  ;;  %v774_v1 = vmul.f32 0.6931472, %v1079_v56  ;;  %v784_v2 = vadd.f32 %v770_v55, %v720_v53 }
 0x261   :  { %v1083_v3 = vpop.eup %1082  ;;  %v776_v60 = vmul.f32 0.6931472, %v1081_v61  ;;  %v785_v18 = vadd.f32 %v772_v58, %v721_v57  ;;  %792 = vst [vmem:[#allocation2 + $0x40] sm:$0xff] %v783_v59 }
 0x262   :  { %v1085_v28 = vpop.eup %1084  ;;  %v778_v7 = vmul.f32 0.6931472, %v1083_v3  ;;  %v786_v30 = vadd.f32 %v774_v1, %v722_v0  ;;  %793 = vst [vmem:[#allocation2 + $0x48] sm:$0xff] %v784_v2 }
 0x263   :  { %v1087_v63 = vpop.eup %1086  ;;  %v780_v9 = vmul.f32 0.6931472, %v1085_v28  ;;  %v787_v6 = vadd.f32 %v776_v60, %v723_v4  ;;  %794 = vst [vmem:[#allocation2 + $0x50] sm:$0xff] %v785_v18 }
 0x264   :  { %v782_v12 = vmul.f32 0.6931472, %v1087_v63  ;;  %v788_v13 = vadd.f32 %v778_v7, %v724_v62  ;;  %795 = vst [vmem:[#allocation2 + $0x58] sm:$0xff] %v786_v30 }
 0x265   :  { %v789_v25 = vadd.f32 %v780_v9, %v725_v5  ;;  %796 = vst [vmem:[#allocation2 + $0x60] sm:$0xff] %v787_v6 }
 0x266   :  { %v790_v29 = vadd.f32 %v782_v12, %v726_v10  ;;  %797 = vst [vmem:[#allocation2 + $0x68] sm:$0xff] %v788_v13 }
 0x267   :  { %798 = vst [vmem:[#allocation2 + $0x70] sm:$0xff] %v789_v25 }
 0x268   :  { %799 = vst [vmem:[#allocation2 + $0x78] sm:$0xff] %v790_v29 }
 0x269   :  { %812 = dma.vmem_to_hbm [thread:$0]  %s805_s21, 2048, %s807_s24, [#allocation3], %s1118_s3, %s1118_s3, %s1119_s25  }
 0x26a   :  { %1112 = dma.done.wait [#allocation3], 2048  }
 0x26b   :  { %1113 = vsyncadd [#allocation3], 4294965248 }
 0x26c   :  { %817 = vsyncpa [#allocation3], 1 }

</bundles_post_ra>
